<compile_context>
chip_gen: v5e
topology: v5e:2x2
jax: 0.10.0
libtpu: 0.0.40
codegen_flags: <defaults>
</compile_context>

<pallas_src>
import jax
import jax.numpy as jnp
from jax import lax
from jax.experimental import pallas as pl
from jax.experimental.pallas import tpu as pltpu


def channel_gate_kernel(x_ref, w1_ref, b1_ref, w2_ref, b2_ref, o_ref):
    # x_ref: (Bb, C, HW) caller dtype; w1_ref: (Ch, C) f32; b1_ref: (1, Ch) f32
    # w2_ref: (C, Ch) f32; b2_ref: (1, C) f32; o_ref: (Bb, C, HW) caller dtype.
    x = x_ref[...]
    bb, _, hw = x.shape

    # Global spatial pooling (== avg/max_pool2d with kernel = full HxW).
    # Sum accumulates in f32; max is order-preserving so reduce in native dtype.
    avg_pool = jnp.sum(x.astype(jnp.float32), axis=2) * (1.0 / float(hw))  # (Bb, C)
    max_pool = jnp.max(x, axis=2).astype(jnp.float32)                      # (Bb, C)

    # Fused shared MLP: both pool types for all Bb images in one shot.
    pooled = jnp.concatenate([avg_pool, max_pool], axis=0)                 # (2*Bb, C)
    h = lax.dot_general(pooled, w1_ref[...],
                        (((1,), (1,)), ((), ())),
                        preferred_element_type=jnp.float32) + b1_ref[...]
    h = jnp.maximum(h, 0.0)                                                # ReLU
    att = lax.dot_general(h, w2_ref[...],
                          (((1,), (1,)), ((), ())),
                          preferred_element_type=jnp.float32) + b2_ref[...]

    channel_att_sum = att[:bb] + att[bb:]                                  # (Bb, C)
    scale = jax.nn.sigmoid(channel_att_sum)                                # (Bb, C) f32

    # Gate in the caller's dtype — no full-block f32 materialization.
    o_ref[...] = x * scale.astype(x.dtype)[:, :, None]


def _pick_block_batch(B, per_batch_bytes, max_block_bytes):
    bb_cap = max(1, int(max_block_bytes // max(per_batch_bytes, 1)))
    if B >= 2:
        # Keep >= 2 grid steps so both v7x TensorCores can take a share.
        bb_cap = min(bb_cap, B // 2)
    bb_cap = max(1, min(bb_cap, B))
    # Largest divisor of B that fits (keeps every block full / in-bounds).
    return max(d for d in range(1, bb_cap + 1) if B % d == 0)


def channel_gate(x, w1, b1, w2, b2, *, max_block_bytes=2 << 20):
    """x: (B, C, H, W), any float dtype. w1: (Ch, C), b1: (Ch,), w2: (C, Ch), b2: (C,)."""
    B, C, H, W = x.shape
    Ch = w1.shape[0]
    HW = H * W

    xf = x.reshape(B, C, HW)                       # caller dtype preserved (view)
    w1f = jnp.asarray(w1, jnp.float32)             # (Ch, C), no transpose
    w2f = jnp.asarray(w2, jnp.float32)             # (C, Ch), no transpose
    b1r = jnp.asarray(b1, jnp.float32).reshape(1, Ch)
    b2r = jnp.asarray(b2, jnp.float32).reshape(1, C)

    itemsize = jnp.dtype(x.dtype).itemsize
    block_b = _pick_block_batch(B, C * HW * itemsize, max_block_bytes)
    grid_b = B // block_b

    out = pl.pallas_call(
        channel_gate_kernel,
        out_shape=jax.ShapeDtypeStruct((B, C, HW), xf.dtype),
        grid_spec=pltpu.PrefetchScalarGridSpec(
            num_scalar_prefetch=0,
            grid=(grid_b,),
            in_specs=[
                pl.BlockSpec((block_b, C, HW), lambda b: (b, 0, 0)),
                pl.BlockSpec((Ch, C), lambda b: (0, 0)),   # VMEM-resident weights
                pl.BlockSpec((1, Ch), lambda b: (0, 0)),
                pl.BlockSpec((C, Ch), lambda b: (0, 0)),
                pl.BlockSpec((1, C), lambda b: (0, 0)),
            ],
            out_specs=pl.BlockSpec((block_b, C, HW), lambda b: (b, 0, 0)),
        ),
        compiler_params=pltpu.CompilerParams(
            dimension_semantics=("parallel",),
            vmem_limit_bytes=32 * 1024 * 1024,
        ),
        input_output_aliases={0: 0},               # output reuses x's HBM buffer
    )(xf, w1f, b1r, w2f, b2r)
    return out.reshape(B, C, H, W)


def channel_gate_ref(x, w1, b1, w2, b2):
    """Pure-JAX reference mirroring the PyTorch forward (f32 math)."""
    B, C, H, W = x.shape
    xf = x.reshape(B, C, H * W).astype(jnp.float32)
    avg_pool = jnp.mean(xf, axis=2)
    max_pool = jnp.max(xf, axis=2)

    def mlp(v):
        h = jnp.maximum(v @ w1.T + b1, 0.0)
        return h @ w2.T + b2

    att = mlp(avg_pool) + mlp(max_pool)
    scale = jax.nn.sigmoid(att)[:, :, None, None]
    return x.astype(jnp.float32) * scale


if __name__ == "__main__":
    # Module config: gate_channels=64, reduction_ratio=16 -> hidden=4,
    # pool_types=['avg', 'max'] (the defaults).
    B, C, H, W = 8, 64, 8, 8
    reduction_ratio = 16
    Ch = C // reduction_ratio

    key = jax.random.PRNGKey(0)
    kx, k1, k2, k3, k4 = jax.random.split(key, 5)

    x = jax.random.normal(kx, (B, C, H, W), dtype=jnp.float32)
    w1 = jax.random.normal(k1, (Ch, C), dtype=jnp.float32) * 0.1
    b1 = jax.random.normal(k2, (Ch,), dtype=jnp.float32) * 0.1
    w2 = jax.random.normal(k3, (C, Ch), dtype=jnp.float32) * 0.1
    b2 = jax.random.normal(k4, (C,), dtype=jnp.float32) * 0.1

    # Compute the reference before the kernel (kernel aliases its flattened
    # input buffer).
    ref = channel_gate_ref(x, w1, b1, w2, b2)

    # f32 path: B=8 -> Bb=4 per step, grid=(2,).
    out = channel_gate(x, w1, b1, w2, b2)
    jax.block_until_ready(out)
    assert out.shape == x.shape
    assert jnp.allclose(out, ref, atol=1e-5, rtol=1e-5), "f32 mismatch vs reference"

    # bf16 pass-through path: x stays bf16 through the DMA and the gating
    # multiply; pooled/MLP math in f32.
    xb = x[:2].astype(jnp.bfloat16)
    ref_b = channel_gate_ref(xb.astype(jnp.float32), w1, b1, w2, b2)
    out_b = channel_gate(xb, w1, b1, w2, b2)
    jax.block_until_ready(out_b)
    assert out_b.dtype == jnp.bfloat16
    assert jnp.allclose(out_b.astype(jnp.float32), ref_b, atol=1e-1, rtol=1e-1), \
        "bf16 mismatch vs reference"

    print("KERNEL_OK")
</pallas_src>

<mosaic_0001>
module attributes {stable_mosaic.version = 11 : i64} {
  func.func @channel_gate_kernel(%arg0: i32, %arg1: memref<4x64x64xf32, #tpu.memory_space<vmem>>, %arg2: memref<4x64xf32, #tpu.memory_space<vmem>>, %arg3: memref<1x4xf32, #tpu.memory_space<vmem>>, %arg4: memref<64x4xf32, #tpu.memory_space<vmem>>, %arg5: memref<1x64xf32, #tpu.memory_space<vmem>>, %arg6: memref<4x64x64xf32, #tpu.memory_space<vmem>>) attributes {dimension_semantics = [#tpu.dimension_semantics<parallel>], iteration_bounds = array<i64: 2>, scalar_prefetch = 0 : i64, scratch_operands = 0 : i64, tpu.core_type = #tpu.core_type<tc>, window_params = [{transform_indices = @transform_0, window_bounds = array<i64: 4, 64, 64>}, {pipeline_mode = #tpu.pipeline_mode<synchronous>, transform_indices = @transform_1, window_bounds = array<i64: 4, 64>}, {pipeline_mode = #tpu.pipeline_mode<synchronous>, transform_indices = @transform_2, window_bounds = array<i64: 1, 4>}, {pipeline_mode = #tpu.pipeline_mode<synchronous>, transform_indices = @transform_3, window_bounds = array<i64: 64, 4>}, {pipeline_mode = #tpu.pipeline_mode<synchronous>, transform_indices = @transform_4, window_bounds = array<i64: 1, 64>}, {transform_indices = @transform_5, window_bounds = array<i64: 4, 64, 64>}]} {
    %c0 = arith.constant 0 : index
    %c0_0 = arith.constant 0 : index
    %c0_1 = arith.constant 0 : index
    %0 = vector.load %arg1[%c0, %c0_0, %c0_1] : memref<4x64x64xf32, #tpu.memory_space<vmem>>, vector<4x64x64xf32>
    %cst = arith.constant dense<0.000000e+00> : vector<4x64xf32>
    %1 = vector.multi_reduction <add>, %0, %cst [2] : vector<4x64x64xf32> to vector<4x64xf32>
    %cst_2 = arith.constant 1.562500e-02 : f32
    %2 = vector.broadcast %cst_2 : f32 to vector<4x64xf32>
    %3 = arith.mulf %1, %2 : vector<4x64xf32>
    %cst_3 = arith.constant dense<0xFF800000> : vector<4x64xf32>
    %4 = vector.multi_reduction <maximumf>, %0, %cst_3 [2] : vector<4x64x64xf32> to vector<4x64xf32>
    %5 = tpu.concatenate %3, %4 in 0 : vector<4x64xf32>, vector<4x64xf32> -> vector<8x64xf32>
    %c0_4 = arith.constant 0 : index
    %c0_5 = arith.constant 0 : index
    %6 = vector.load %arg2[%c0_4, %c0_5] : memref<4x64xf32, #tpu.memory_space<vmem>>, vector<4x64xf32>
    %cst_6 = arith.constant dense<0.000000e+00> : vector<8x4xf32>
    %7 = tpu.matmul %5, %6, %cst_6 {dimension_numbers = #tpu.dot_dimension_numbers<[1], [1], [0], [0], [0, 0, 1, 0], [], []>} : vector<8x64xf32>, vector<4x64xf32>, vector<8x4xf32> -> vector<8x4xf32>
    %c0_7 = arith.constant 0 : index
    %c0_8 = arith.constant 0 : index
    %8 = vector.load %arg3[%c0_7, %c0_8] : memref<1x4xf32, #tpu.memory_space<vmem>>, vector<1x4xf32>
    %9 = vector.broadcast %8 : vector<1x4xf32> to vector<8x4xf32>
    %10 = arith.addf %7, %9 : vector<8x4xf32>
    %cst_9 = arith.constant 0.000000e+00 : f32
    %11 = vector.broadcast %cst_9 : f32 to vector<8x4xf32>
    %12 = arith.maximumf %10, %11 : vector<8x4xf32>
    %c0_10 = arith.constant 0 : index
    %c0_11 = arith.constant 0 : index
    %13 = vector.load %arg4[%c0_10, %c0_11] : memref<64x4xf32, #tpu.memory_space<vmem>>, vector<64x4xf32>
    %cst_12 = arith.constant dense<0.000000e+00> : vector<8x64xf32>
    %14 = tpu.matmul %12, %13, %cst_12 {dimension_numbers = #tpu.dot_dimension_numbers<[1], [1], [0], [0], [0, 0, 1, 0], [], []>} : vector<8x4xf32>, vector<64x4xf32>, vector<8x64xf32> -> vector<8x64xf32>
    %c0_13 = arith.constant 0 : index
    %c0_14 = arith.constant 0 : index
    %15 = vector.load %arg5[%c0_13, %c0_14] : memref<1x64xf32, #tpu.memory_space<vmem>>, vector<1x64xf32>
    %16 = vector.broadcast %15 : vector<1x64xf32> to vector<8x64xf32>
    %17 = arith.addf %14, %16 : vector<8x64xf32>
    %18 = vector.extract_strided_slice %17 {offsets = [0, 0], sizes = [4, 64], strides = [1, 1]} : vector<8x64xf32> to vector<4x64xf32>
    %19 = vector.extract_strided_slice %17 {offsets = [4, 0], sizes = [4, 64], strides = [1, 1]} : vector<8x64xf32> to vector<4x64xf32>
    %20 = arith.addf %18, %19 : vector<4x64xf32>
    %21 = arith.negf %20 : vector<4x64xf32>
    %22 = math.exp %21 : vector<4x64xf32>
    %cst_15 = arith.constant 1.000000e+00 : f32
    %23 = vector.broadcast %cst_15 : f32 to vector<4x64xf32>
    %24 = arith.addf %23, %22 : vector<4x64xf32>
    %25 = arith.divf %23, %24 : vector<4x64xf32>
    %26 = vector.shape_cast %25 : vector<4x64xf32> to vector<4x64x1xf32>
    %27 = vector.broadcast %26 : vector<4x64x1xf32> to vector<4x64x64xf32>
    %28 = arith.mulf %0, %27 : vector<4x64x64xf32>
    %c0_16 = arith.constant 0 : index
    %c0_17 = arith.constant 0 : index
    %c0_18 = arith.constant 0 : index
    %29 = vector.load %arg6[%c0_16, %c0_17, %c0_18] : memref<4x64x64xf32, #tpu.memory_space<vmem>>, vector<4x64x64xf32>
    tpu.vector_store %arg6[%c0_16, %c0_17, %c0_18], %28 {strides = array<i32>} : memref<4x64x64xf32, #tpu.memory_space<vmem>>, vector<4x64x64xf32>,
    return
  }
  func.func @transform_0(%arg0: i32) -> (i32, i32, i32) {
    %c0_i32 = arith.constant 0 : i32
    %c0_i32_0 = arith.constant 0 : i32
    %c0_i32_1 = arith.constant 0 : i32
    return %arg0, %c0_i32, %c0_i32_0 : i32, i32, i32
  }
  func.func @transform_1(%arg0: i32) -> (i32, i32) {
    %c0_i32 = arith.constant 0 : i32
    %c0_i32_0 = arith.constant 0 : i32
    %c0_i32_1 = arith.constant 0 : i32
    return %c0_i32, %c0_i32_0 : i32, i32
  }
  func.func @transform_2(%arg0: i32) -> (i32, i32) {
    %c0_i32 = arith.constant 0 : i32
    %c0_i32_0 = arith.constant 0 : i32
    %c0_i32_1 = arith.constant 0 : i32
    return %c0_i32, %c0_i32_0 : i32, i32
  }
  func.func @transform_3(%arg0: i32) -> (i32, i32) {
    %c0_i32 = arith.constant 0 : i32
    %c0_i32_0 = arith.constant 0 : i32
    %c0_i32_1 = arith.constant 0 : i32
    return %c0_i32, %c0_i32_0 : i32, i32
  }
  func.func @transform_4(%arg0: i32) -> (i32, i32) {
    %c0_i32 = arith.constant 0 : i32
    %c0_i32_0 = arith.constant 0 : i32
    %c0_i32_1 = arith.constant 0 : i32
    return %c0_i32, %c0_i32_0 : i32, i32
  }
  func.func @transform_5(%arg0: i32) -> (i32, i32, i32) {
    %c0_i32 = arith.constant 0 : i32
    %c0_i32_0 = arith.constant 0 : i32
    %c0_i32_1 = arith.constant 0 : i32
    return %arg0, %c0_i32, %c0_i32_0 : i32, i32, i32
  }
}

</mosaic_0001>

<bundles_post_ra>
// kernel: tpu_custom_call.1
= control target key start
LH: loop header
LB: loop body
LE: loop exit
PB: predicated region body
PF: predicated region fallthrough
CT: control target
= control target key end

     0   :  { %10 = vsyncpa [#allocation3], 0  ;;  %s2141_s0 = inlined_call_operand.hbm [shape: f32[8,64,64], index: 0, kind: input, shape index: {}, may-alias: {0,5}]   ;;  %s2142_s1 = inlined_call_operand.vmem [shape: f32[4,64], index: 1, kind: input, shape index: {}]   ;;  %s2143_s2 = inlined_call_operand.vmem [shape: f32[1,4], index: 2, kind: input, shape index: {}]   ;;  %s2144_s3 = inlined_call_operand.vmem [shape: f32[64,4], index: 3, kind: input, shape index: {}]   ;;  %s2145_s4 = inlined_call_operand.vmem [shape: f32[1,64], index: 4, kind: input, shape index: {}]   ;;  %s2146_s5 = inlined_call_operand.hbm [shape: f32[8,64,64], index: 5, kind: output, shape index: {}, may-alias: {0,5}]  }
   0x1   :  { %12 = vsyncpa [#allocation3 + $0x1], 0 }
   0x2   :  { %13 = vsyncpa [#allocation4], 0 }
   0x3   :  { %15 = vsyncpa [#allocation4 + $0x1], 0  ;;  %s1456_s18 = smov 0   ;;  %s1458_s19 = smov 0  }
   0x4   :  { %s1460_s20 = smov 0   ;;  %s1462_s21 = smov 0  }
   0x5 LB: > { %s1477_s22 = sadd.s32 4294967295, %s1420_s21   ;;  %s1186_s23 = sadd.s32 4294967294, %s1420_s21   ;;  %s1420_s21 = sphi %s1462_s21, %s2156_s21   ;;  %s1416_s20 = sphi %s1460_s20, %s2155_s20   ;;  %s1412_s19 = sphi %s1458_s19, %s2154_s19   ;;  %s1408_s18 = sphi %s1456_s18, %s2153_s18  }
   0x6   : > { %s1481_s24 = sadd.s32 1, %s1420_s21   ;;  %s28_s25 = sadd.s32 1, %s1416_s20 }
   0x7   : > { %s25_s26 = ssub.s32 %s1420_s21, %s1481_s24  ;;  %p35_p0 = scmp.ne.s32.totalorder %s1416_s20, %s1412_s19 }
   0x8   : > { %p26_p1 = scmp.eq.s32.totalorder %s25_s26, 0  ;;  %p36_p2 = scmp.eq.s32.totalorder %s1420_s21, 0 }
   0x9   : > { %p41_p3 = scmp.ne.s32.totalorder %s1412_s19, %s1408_s18  ;;  %p42_p4 = scmp.eq.s32.totalorder %s1477_s22, 0 }
   0xa   : > { %s1493_s27 = scalar_select %p26_p1, %s1416_s20, %s28_s25  }
   0xb   : > { %p1495_p5 = por %p36_p2, %p35_p0  ;;  %p1499_p6 = por %p42_p4, %p41_p3 }
   0xc   : > { %p149_p7 = scmp.eq.s32.totalorder %s1477_s22, 1  ;;  %p155_p8 = scmp.eq.s32.totalorder %s1186_s23, 1 }
   0xd   : > { %p1230_p10 = scmp.lt.s32.totalorder %s1420_s21, 2  ;;  %s187_s7 = sand.u32 1, %s1416_s20  }
   0xe   : > { %p1506_p11 = por %p149_p7, %p35_p0  ;;  %p1510_p12 = por %p155_p8, %p41_p3 }
   0xf   : > { %s1215_s8 = sshll.u32 %s1420_s21, 8  ;;  %s1189_s9 = sshll.u32 %s187_s7, 8 }
  0x10   : > { %s197_s12 = scalar_lea.hbm %s2141_s0, %s1215_s8  ;;  %s191_s14 = scalar_lea.vmem [#allocation2], %s1189_s9 }
  0x11   : > { %s198_s13 = sshll.u32 %s197_s12, 4  ;;  %s200_s15 = sshll.u32 %s191_s14, 4  ;;  %s199_s13 = int_to_ptr.hbm [resolvable:$true] %s198_s13  ;;  %s201_s15 = int_to_ptr.vmem [resolvable:$true] %s200_s15 }
  0x12   : > { %p1521_p13 = pnand %p1230_p10, %p1495_p5  ;;  %p1193_p0 = scmp.ge.s32.totalorder %s1420_s21, 1 }
  0x13   : > { %p208_p1 = scmp.lt.s32.totalorder %s1420_s21, 3  ;;  %s188_s17 = scalar_lea.sflag [#allocation3], %s187_s7 }
  0x14   : > { %s1324_s23 = sshra.s32 %s199_s13, 4  ;;  %p1328_p3 = pneg %p1521_p13  ;;  %s1325_s23 = int_to_ptr.hbm [resolvable:$true] %s1324_s23 }
  0x15   : > { %s1326_s25 = scalar_lea.hbm %s1325_s23, 256  ;;  %s1331_s28 = scalar_lea.hbm %s2141_s0, 512 }
  0x16   : > { %p1327_p2 = scmp.ne.s32.totalorder %s1325_s23, %s1326_s25  ;;  %p1332_p5 = scmp.lt.s32.totalorder %s1325_s23, %s2141_s0 }
  0x17   : > { %p1333_p8 = scmp.lt.s32.totalorder %s1331_s28, %s1326_s25 }
  0x18   : > { %p1329_p4 = pnand %p1328_p3, %p1327_p2 }
  0x19   : > { %p1334_p10 = por %p1333_p8, %p1332_p5 }
  0x1a   : > { %p1330_p7 = pneg %p1329_p4 }
  0x1c   : > { %p1335_p9 = pnand %p1334_p10, %p1330_p7 }
  0x1e   : > { %1338 = shalt.err (!%p1335_p9)
}
  0x1f   : > { %s1422_s7 = smov 128   ;;  %s1423_s11 = smov 8  }
  0x20   : > { %1225 = dma.hbm_to_vmem [thread:$0]  (!%p1521_p13), %s199_s13, 4096, %s201_s15, %s188_s17, %s1422_s7, %s1422_s7, %s1423_s11  }
  0x21   : > { %p209_p2 = pnand %p1193_p0, %p208_p1 }
  0x22   : > { %s1542_s12 = sand.u32 (!%p209_p2), 1, %s1412_s19  }
  0x23   : > { %212 = sbr.rel (%p209_p2) target bundleno = 939 (0x3ab), region = 40  ;;  %s1194_s14 = sshll.u32 (!%p209_p2), %s1542_s12, 8 }
  0x24   : > { %s215_s23 = scalar_lea.sflag (!%p209_p2), [#allocation3], %s1542_s12  ;;  %s1548_s25 = scalar_lea.vmem (!%p209_p2), [#allocation2], %s1194_s14 }
  0x28   : > { %1399 = dma.done.wait (%p1499_p6), %s215_s23, 4096  }
  0x29   : > { %1401 = vsyncadd (%p1499_p6), %s215_s23, 4294963200  ;;  %vm280_vm0 = vcmask 523264   ;;  %v256_v0 = vld [vmem:[%s1548_s25 + $0x40] sm:$0xff]  ;;  %v250_v1 = vld [vmem:[%s1548_s25 + $0x10] sm:$0xff]  ;;  %vm542_vm1 = vcmask 130112   ;;  %vm546_vm2 = vcmask 195712  }
  0x2a   : > { %v248_v2 = vld [vmem:[%s1548_s25] sm:$0xff]  ;;  %v305_v3 = vsel %vm280_vm0, %v256_v0, 0.0  ;;  %v287_v4 = vsel %vm280_vm0, %v250_v1, 0.0  ;;  %v257_v6 = vld [vmem:[%s1548_s25 + $0x48] sm:$0xff]  ;;  %v258_v7 = vld [vmem:[%s1548_s25 + $0x50] sm:$0xff]  ;;  %v433_v31 = vsel %vm280_vm0, %v256_v0, -inf }
  0x2b   : > { %v281_v5 = vsel %vm280_vm0, %v248_v2, 0.0  ;;  %306 = vadd.xlane.f32.xlu1 %v305_v3  ;;  %288 = vadd.xlane.f32.xlu2 %v287_v4  ;;  %v1563_v8 = vld [vmem:[%s1548_s25 + $0x8] sm:$0xff]  ;;  %v308_v9 = vsel %vm280_vm0, %v257_v6, 0.0  ;;  %v311_v10 = vsel %vm280_vm0, %v258_v7, 0.0  ;;  %v1571_v13 = vld [vmem:[%s1548_s25 + $0x18] sm:$0xff]  ;;  %v264_v14 = vld [vmem:[%s1548_s25 + $0x80] sm:$0xff] }
  0x2c   : > { %282 = vadd.xlane.f32.xlu0 %v281_v5  ;;  %v284_v11 = vsel %vm280_vm0, %v1563_v8, 0.0  ;;  %v265_v12 = vld [vmem:[%s1548_s25 + $0x88] sm:$0xff]  ;;  %v290_v16 = vsel %vm280_vm0, %v1571_v13, 0.0  ;;  %v329_v17 = vsel %vm280_vm0, %v264_v14, 0.0  ;;  %v266_v18 = vld [vmem:[%s1548_s25 + $0x90] sm:$0xff]  ;;  %v272_v19 = vld [vmem:[%s1548_s25 + $0xc0] sm:$0xff] }
  0x2d   : > { %v332_v15 = vsel %vm280_vm0, %v265_v12, 0.0  ;;  %v259_v20 = vld [vmem:[%s1548_s25 + $0x58] sm:$0xff]  ;;  %v335_v21 = vsel %vm280_vm0, %v266_v18, 0.0  ;;  %v353_v22 = vsel %vm280_vm0, %v272_v19, 0.0  ;;  %v273_v24 = vld [vmem:[%s1548_s25 + $0xc8] sm:$0xff]  ;;  %v412_v25 = vsel %vm280_vm0, %v1563_v8, -inf }
  0x2e   : > { %v314_v23 = vsel %vm280_vm0, %v259_v20, 0.0  ;;  %v409_v26 = vsel %vm280_vm0, %v248_v2, -inf  ;;  %v356_v27 = vsel %vm280_vm0, %v273_v24, 0.0  ;;  %v1590_v28 = vld [vmem:[%s1548_s25 + $0x20] sm:$0xff]  ;;  %v436_v30 = vsel %vm280_vm0, %v257_v6, -inf  ;;  %v274_v32 = vld [vmem:[%s1548_s25 + $0xd0] sm:$0xff] }
  0x2f   : > { %v293_v29 = vsel %vm280_vm0, %v1590_v28, 0.0  ;;  %v1598_v33 = vld [vmem:[%s1548_s25 + $0x98] sm:$0xff]  ;;  %v260_v34 = vld [vmem:[%s1548_s25 + $0x60] sm:$0xff]  ;;  %v359_v35 = vsel %vm280_vm0, %v274_v32, 0.0  ;;  %v457_v38 = vsel %vm280_vm0, %v264_v14, -inf  ;;  %v439_v39 = vsel %vm280_vm0, %v258_v7, -inf }
  0x30   : > { %v338_v36 = vsel %vm280_vm0, %v1598_v33, 0.0  ;;  %v317_v37 = vsel %vm280_vm0, %v260_v34, 0.0  ;;  %v415_v40 = vsel %vm280_vm0, %v250_v1, -inf  ;;  %v261_v41 = vld [vmem:[%s1548_s25 + $0x68] sm:$0xff]  ;;  %v460_v45 = vsel %vm280_vm0, %v265_v12, -inf  ;;  %v1617_v46 = vld [vmem:[%s1548_s25 + $0xd8] sm:$0xff] }
  0x31   : > { %v1610_v42 = vld [vmem:[%s1548_s25 + $0x28] sm:$0xff]  ;;  %v320_v43 = vsel %vm280_vm0, %v261_v41, 0.0  ;;  %v1620_v47 = vld [vmem:[%s1548_s25 + $0xa0] sm:$0xff]  ;;  %v418_v48 = vsel %vm280_vm0, %v1571_v13, -inf  ;;  %v362_v49 = vsel %vm280_vm0, %v1617_v46, 0.0  ;;  %v481_v51 = vsel %vm280_vm0, %v272_v19, -inf }
  0x32   : > { %v296_v44 = vsel %vm280_vm0, %v1610_v42, 0.0  ;;  %v341_v50 = vsel %vm280_vm0, %v1620_v47, 0.0  ;;  %v463_v52 = vsel %vm280_vm0, %v266_v18, -inf  ;;  %v442_v53 = vsel %vm280_vm0, %v259_v20, -inf  ;;  %v1632_v54 = vld [vmem:[%s1548_s25 + $0x70] sm:$0xff]  ;;  %v1643_v59 = vld [vmem:[%s1548_s25 + $0xe0] sm:$0xff] }
  0x33   : > { %309 = vadd.xlane.f32.xlu1 %v308_v9  ;;  %312 = vadd.xlane.f32.xlu2 %v311_v10  ;;  %v1635_v55 = vld [vmem:[%s1548_s25 + $0x30] sm:$0xff]  ;;  %v323_v56 = vsel %vm280_vm0, %v1632_v54, 0.0  ;;  %v484_v58 = vsel %vm280_vm0, %v273_v24, -inf  ;;  %v1646_v60 = vld [vmem:[%s1548_s25 + $0xa8] sm:$0xff]  ;;  %v421_v61 = vsel %vm280_vm0, %v1590_v28, -inf  ;;  %v365_v62 = vsel %vm280_vm0, %v1643_v59, 0.0 }
  0x34   : > { %285 = vadd.xlane.f32.xlu0 %v284_v11  ;;  %v299_v57 = vsel %vm280_vm0, %v1635_v55, 0.0  ;;  %v344_v63 = vsel %vm280_vm0, %v1646_v60, 0.0  ;;  %v487_v0 = vsel %vm280_vm0, %v274_v32, -inf  ;;  %v466_v1 = vsel %vm280_vm0, %v1598_v33, -inf  ;;  %v1659_v3 = vld [vmem:[%s1548_s25 + $0xb0] sm:$0xff]  ;;  %v1662_v4 = vld [vmem:[%s1548_s25 + $0x78] sm:$0xff] }
  0x35   : > { %v445_v2 = vsel %vm280_vm0, %v260_v34, -inf  ;;  %v1665_v5 = vld [vmem:[%s1548_s25 + $0x38] sm:$0xff]  ;;  %v347_v6 = vsel %vm280_vm0, %v1659_v3, 0.0  ;;  %v326_v7 = vsel %vm280_vm0, %v1662_v4, 0.0  ;;  %v1674_v12 = vld [vmem:[%s1548_s25 + $0xe8] sm:$0xff]  ;;  %v537_v14 = vlaneseq  ;;  %s1993_s10 = scalar_lea.vmem [#allocation5], %s1194_s14 }
  0x36   : > { %v302_v9 = vsel %vm280_vm0, %v1665_v5, 0.0  ;;  %v368_v18 = vsel %vm280_vm0, %v1674_v12, 0.0  ;;  %vm550_vm3 = vcmask 261312   ;;  %vm554_vm4 = vcmask 326912   ;;  %s1217_s14 = sshll.u32 %s1477_s22, 8  ;;  %s1110_s29 = sshll.u32 %s1993_s10, 4  ;;  %s1111_s29 = int_to_ptr.vmem [resolvable:$true] %s1110_s29 }
  0x37   : > { %v1682_v19 = vand.u32 127, %v537_v14  ;;  %vm558_vm5 = vcmask 392512   ;;  %vm562_vm6 = vcmask 458112   ;;  %vm566_vm7 = vcmask 523712   ;;  %s1109_s23 = scalar_lea.hbm %s2146_s5, %s1217_s14  ;;  %s1097_s15 = scalar_lea.sflag [#allocation4], %s1542_s12 }
  0x38   : > { %vm613_vm8 = vcmask 1041409   ;;  %vm615_vm9 = vcmask 1042434   ;;  %vm765_vm10 = vcmask 31744   ;;  %vm617_vm11 = vcmask 1043459   ;;  %s1112_s13 = sshll.u32 %s1109_s23, 4  ;;  %s1374_s26 = scalar_lea.hbm %s2146_s5, 512  ;;  %s1113_s13 = int_to_ptr.hbm [resolvable:$true] %s1112_s13 }
  0x39   : > { %vm712_vm12 = vcmask 1045509   ;;  %vm714_vm13 = vcmask 1046534   ;;  %vm716_vm14 = vcmask 1047559   ;;  %vm719_vm15 = vcmask 1043456  }
  0x3b   : > { %333 = vadd.xlane.f32.xlu1 %v332_v15  ;;  %291 = vadd.xlane.f32.xlu2 %v290_v16  ;;  %v448_v16 = vsel %vm280_vm0, %v261_v41, -inf }
  0x3c   : > { %330 = vadd.xlane.f32.xlu0 %v329_v17  ;;  %v424_v17 = vsel %vm280_vm0, %v1610_v42, -inf }
  0x43   : > { %336 = vadd.xlane.f32.xlu1 %v335_v21  ;;  %354 = vadd.xlane.f32.xlu2 %v353_v22  ;;  %v1685_v21 = vadd.s32 4294967288, %v1682_v19  ;;  %v1688_v22 = vld [vmem:[%s1548_s25 + $0xb8] sm:$0xff] }
  0x44   : > { %315 = vadd.xlane.f32.xlu0 %v314_v23  ;;  %v1691_v23 = vadd.s32 4294967280, %v1682_v19 }
  0x4b   : > { %413 = vmax.xlane.f32.xlu2 %v412_v25  ;;  %410 = vmax.xlane.f32.xlu1 %v409_v26 }
  0x4c   : > { %357 = vadd.xlane.f32.xlu0 %v356_v27 }
  0x53   : > { %294 = vadd.xlane.f32.xlu2 %v293_v29  ;;  %437 = vmax.xlane.f32.xlu1 %v436_v30 }
  0x54   : > { %434 = vmax.xlane.f32.xlu0 %v433_v31 }
  0x5b   : > { %360 = vadd.xlane.f32.xlu2 %v359_v35  ;;  %339 = vadd.xlane.f32.xlu1 %v338_v36  ;;  %v350_v35 = vsel %vm280_vm0, %v1688_v22, 0.0  ;;  %v490_v36 = vsel %vm280_vm0, %v1617_v46, -inf }
  0x5c   : > { %318 = vadd.xlane.f32.xlu0 %v317_v37 }
  0x63   : > { %458 = vmax.xlane.f32.xlu2 %v457_v38  ;;  %440 = vmax.xlane.f32.xlu1 %v439_v39  ;;  %v469_v39 = vsel %vm280_vm0, %v1620_v47, -inf }
  0x64   : > { %416 = vmax.xlane.f32.xlu0 %v415_v40 }
  0x6b   : > { %321 = vadd.xlane.f32.xlu2 %v320_v43  ;;  %297 = vadd.xlane.f32.xlu1 %v296_v44 }
  0x6c   : > { %461 = vmax.xlane.f32.xlu0 %v460_v45 }
  0x73   : > { %419 = vmax.xlane.f32.xlu2 %v418_v48  ;;  %363 = vadd.xlane.f32.xlu1 %v362_v49  ;;  %v1709_v48 = vadd.s32 4294967272, %v1682_v19 }
  0x74   : > { %342 = vadd.xlane.f32.xlu0 %v341_v50 }
  0x7b   : > { %482 = vmax.xlane.f32.xlu2 %v481_v51  ;;  %464 = vmax.xlane.f32.xlu1 %v463_v52  ;;  %v1713_v51 = vld [vmem:[%s1548_s25 + $0xf0] sm:$0xff] }
  0x7c   : > { %443 = vmax.xlane.f32.xlu0 %v442_v53 }
  0x83   : > { %324 = vadd.xlane.f32.xlu2 %v323_v56  ;;  %300 = vadd.xlane.f32.xlu1 %v299_v57 }
  0x84   : > { %485 = vmax.xlane.f32.xlu0 %v484_v58  ;;  %v451_v58 = vsel %vm280_vm0, %v1632_v54, -inf }
  0x8b   : > { %422 = vmax.xlane.f32.xlu2 %v421_v61  ;;  %366 = vadd.xlane.f32.xlu1 %v365_v62  ;;  %v427_v61 = vsel %vm280_vm0, %v1635_v55, -inf }
  0x8c   : > { %345 = vadd.xlane.f32.xlu0 %v344_v63 }
  0x93   : > { %488 = vmax.xlane.f32.xlu2 %v487_v0  ;;  %467 = vmax.xlane.f32.xlu1 %v466_v1  ;;  %v371_v0 = vsel %vm280_vm0, %v1713_v51, 0.0 }
  0x94   : > { %446 = vmax.xlane.f32.xlu0 %v445_v2 }
  0x9b   : > { %348 = vadd.xlane.f32.xlu2 %v347_v6  ;;  %327 = vadd.xlane.f32.xlu1 %v326_v7  ;;  %v1727_v7 = vld [vmem:[%s1548_s25 + $0xf8] sm:$0xff] }
  0x9c   : > { %303 = vadd.xlane.f32.xlu0 %v302_v9 }
  0x9e   : > { %v307_v10 = vpop.xlane.xlu1 %306  ;;  %v289_v11 = vpop.xlane.xlu2 %288 }
  0x9f   : > { %v283_v15 = vpop.xlane.xlu0 %282  ;;  %v385_v20 = vmul.f32 0.015625, %v307_v10  ;;  %v379_v29 = vmul.f32 0.015625, %v289_v11 }
  0xa0   : > { %v377_v24 = vmul.f32 0.015625, %v283_v15 }
  0xa1   : > { %v568_v27 = vperm.slane %v385_v20, %v1682_v19  ;;  %v545_v43 = vperm.slane %v379_v29, %v1691_v23 }
  0xa2   : > { %v539_v40 = vperm.slane %v377_v24, %v1682_v19  ;;  %v472_v24 = vsel %vm280_vm0, %v1646_v60, -inf }
  0xa3   : > { %449 = vmax.xlane.f32.xlu2 %v448_v16  ;;  %425 = vmax.xlane.f32.xlu1 %v424_v17  ;;  %v374_v17 = vsel %vm280_vm0, %v1727_v7, 0.0 }
  0xa4   : > { %369 = vadd.xlane.f32.xlu0 %v368_v18  ;;  %v493_v18 = vsel %vm280_vm0, %v1643_v59, -inf }
  0xa6   : > { %v310_v25 = vpop.xlane.xlu1 %309  ;;  %v313_v26 = vpop.xlane.xlu2 %312 }
  0xa7   : > { %v386_v30 = vmul.f32 0.015625, %v310_v25  ;;  %v387_v31 = vmul.f32 0.015625, %v313_v26  ;;  %v286_v32 = vpop.xlane.xlu0 %285 }
  0xa8   : > { %v378_v34 = vmul.f32 0.015625, %v286_v32 }
  0xa9   : > { %v569_v37 = vperm.slane %v386_v30, %v1685_v21  ;;  %v571_v38 = vperm.slane %v387_v31, %v1691_v23 }
  0xaa   : > { %v541_v41 = vperm.slane %v378_v34, %v1685_v21 }
  0xab   : > { %v570_v44 = vsel %vm542_vm1, %v569_v37, %v568_v27  ;;  %351 = vadd.xlane.f32.xlu2 %v350_v35  ;;  %491 = vmax.xlane.f32.xlu1 %v490_v36  ;;  %v475_v37 = vsel %vm280_vm0, %v1659_v3, -inf }
  0xac   : > { %v572_v45 = vsel %vm546_vm2, %v571_v38, %v570_v44  ;;  %v543_v46 = vsel %vm542_vm1, %v541_v41, %v539_v40  ;;  %470 = vmax.xlane.f32.xlu0 %v469_v39  ;;  %v454_v38 = vsel %vm280_vm0, %v1662_v4, -inf  ;;  %v430_v40 = vsel %vm280_vm0, %v1665_v5, -inf }
  0xad   : > { %v547_v47 = vsel %vm546_vm2, %v545_v43, %v543_v46  ;;  %v1752_v44 = vadd.s32 4294967264, %v1682_v19 }
  0xae   : > { %v334_v49 = vpop.xlane.xlu1 %333  ;;  %v292_v50 = vpop.xlane.xlu2 %291 }
  0xaf   : > { %v394_v52 = vmul.f32 0.015625, %v334_v49  ;;  %v380_v53 = vmul.f32 0.015625, %v292_v50  ;;  %v331_v56 = vpop.xlane.xlu0 %330 }
  0xb0   : > { %v393_v57 = vmul.f32 0.015625, %v331_v56  ;;  %v499_v56 = vsel %vm280_vm0, %v1713_v51, -inf }
  0xb1   : > { %v584_v62 = vperm.slane %v394_v52, %v1685_v21  ;;  %v549_v63 = vperm.slane %v380_v53, %v1709_v48  ;;  %v478_v53 = vsel %vm280_vm0, %v1688_v22, -inf }
  0xb2   : > { %v583_v1 = vperm.slane %v393_v57, %v1682_v19 }
  0xb3   : > { %v551_v2 = vsel %vm550_vm3, %v549_v63, %v547_v47  ;;  %452 = vmax.xlane.f32.xlu2 %v451_v58  ;;  %428 = vmax.xlane.f32.xlu1 %v427_v61  ;;  %v496_v58 = vsel %vm280_vm0, %v1674_v12, -inf }
  0xb4   : > { %v585_v6 = vsel %vm542_vm1, %v584_v62, %v583_v1  ;;  %372 = vadd.xlane.f32.xlu0 %v371_v0 }
  0xb6   : > { %v337_v9 = vpop.xlane.xlu1 %336  ;;  %v355_v10 = vpop.xlane.xlu2 %354 }
  0xb7   : > { %v395_v11 = vmul.f32 0.015625, %v337_v9  ;;  %v316_v15 = vpop.xlane.xlu0 %315  ;;  %v401_v27 = vmul.f32 0.015625, %v355_v10 }
  0xb8   : > { %v388_v16 = vmul.f32 0.015625, %v316_v15 }
  0xb9   : > { %v586_v20 = vperm.slane %v395_v11, %v1691_v23  ;;  %v598_v35 = vperm.slane %v401_v27, %v1682_v19 }
  0xba   : > { %v573_v25 = vperm.slane %v388_v16, %v1709_v48  ;;  %v502_v16 = vsel %vm280_vm0, %v1727_v7, -inf }
  0xbb   : > { %v587_v26 = vsel %vm546_vm2, %v586_v20, %v585_v6  ;;  %375 = vadd.xlane.f32.xlu2 %v374_v17  ;;  %494 = vmax.xlane.f32.xlu1 %v493_v18 }
  0xbc   : > { %v574_v29 = vsel %vm550_vm3, %v573_v25, %v572_v45  ;;  %473 = vmax.xlane.f32.xlu0 %v472_v24 }
  0xbe   : > { %v414_v30 = vpop.xlane.xlu2 %413  ;;  %v411_v31 = vpop.xlane.xlu1 %410 }
  0xbf   : > { %v653_v32 = vperm.slane %v414_v30, %v1685_v21  ;;  %v652_v59 = vperm.slane %v411_v31, %v1682_v19  ;;  %v358_v34 = vpop.xlane.xlu0 %357 }
  0xc0   : > { %v402_v36 = vmul.f32 0.015625, %v358_v34  ;;  %v1778_v34 = vadd.s32 4294967256, %v1682_v19 }
  0xc1   : > { %v654_v39 = vsel %vm542_vm1, %v653_v32, %v652_v59 }
  0xc2   : > { %v599_v41 = vperm.slane %v402_v36, %v1685_v21 }
  0xc3   : > { %476 = vmax.xlane.f32.xlu2 %v475_v37  ;;  %455 = vmax.xlane.f32.xlu1 %v454_v38 }
  0xc4   : > { %v600_v43 = vsel %vm542_vm1, %v599_v41, %v598_v35  ;;  %431 = vmax.xlane.f32.xlu0 %v430_v40 }
  0xc6   : > { %v295_v45 = vpop.xlane.xlu2 %294  ;;  %v438_v46 = vpop.xlane.xlu1 %437 }
  0xc7   : > { %v381_v47 = vmul.f32 0.015625, %v295_v45  ;;  %v668_v49 = vperm.slane %v438_v46, %v1685_v21  ;;  %v435_v50 = vpop.xlane.xlu0 %434 }
  0xc8   : > { %v667_v52 = vperm.slane %v435_v50, %v1682_v19 }
  0xc9   : > { %v553_v57 = vperm.slane %v381_v47, %v1752_v44 }
  0xca   : > { %v669_v61 = vsel %vm542_vm1, %v668_v49, %v667_v52 }
  0xcb   : > { %v555_v62 = vsel %vm554_vm4, %v553_v57, %v551_v2  ;;  %479 = vmax.xlane.f32.xlu1 %v478_v53  ;;  %500 = vmax.xlane.f32.xlu2 %v499_v56 }
  0xcc   : > { %497 = vmax.xlane.f32.xlu0 %v496_v58 }
  0xce   : > { %v361_v63 = vpop.xlane.xlu2 %360  ;;  %v340_v0 = vpop.xlane.xlu1 %339 }
  0xcf   : > { %v403_v1 = vmul.f32 0.015625, %v361_v63  ;;  %v396_v6 = vmul.f32 0.015625, %v340_v0  ;;  %v319_v9 = vpop.xlane.xlu0 %318 }
  0xd0   : > { %v389_v10 = vmul.f32 0.015625, %v319_v9 }
  0xd1   : > { %v601_v11 = vperm.slane %v403_v1, %v1691_v23  ;;  %v588_v15 = vperm.slane %v396_v6, %v1709_v48 }
  0xd2   : > { %v575_v17 = vperm.slane %v389_v10, %v1752_v44 }
  0xd3   : > { %v602_v2 = vsel %vm546_vm2, %v601_v11, %v600_v43  ;;  %v589_v18 = vsel %vm550_vm3, %v588_v15, %v587_v26 }
  0xd4   : > { %v576_v20 = vsel %vm554_vm4, %v575_v17, %v574_v29  ;;  %503 = vmax.xlane.f32.xlu0 %v502_v16  ;;  %v1806_v16 = vadd.s32 4294967248, %v1682_v19 }
  0xd6   : > { %v459_v24 = vpop.xlane.xlu2 %458  ;;  %v441_v25 = vpop.xlane.xlu1 %440 }
  0xd7   : > { %v670_v27 = vperm.slane %v441_v25, %v1691_v23  ;;  %v417_v30 = vpop.xlane.xlu0 %416  ;;  %v682_v35 = vperm.slane %v459_v24, %v1682_v19 }
  0xd8   : > { %v655_v31 = vperm.slane %v417_v30, %v1691_v23 }
  0xd9   : > { %v671_v32 = vsel %vm546_vm2, %v670_v27, %v669_v61 }
  0xda   : > { %v656_v59 = vsel %vm546_vm2, %v655_v31, %v654_v39 }
  0xde   : > { %v322_v26 = vpop.xlane.xlu2 %321  ;;  %v298_v36 = vpop.xlane.xlu1 %297 }
  0xdf   : > { %v390_v29 = vmul.f32 0.015625, %v322_v26  ;;  %v382_v37 = vmul.f32 0.015625, %v298_v36  ;;  %v462_v38 = vpop.xlane.xlu0 %461 }
  0xe0   : > { %v683_v40 = vperm.slane %v462_v38, %v1685_v21 }
  0xe1   : > { %v577_v41 = vperm.slane %v390_v29, %v1778_v34  ;;  %v557_v43 = vperm.slane %v382_v37, %v1778_v34 }
  0xe2   : > { %v684_v45 = vsel %vm542_vm1, %v683_v40, %v682_v35 }
  0xe3   : > { %v578_v39 = vsel %vm558_vm5, %v577_v41, %v576_v20  ;;  %v559_v46 = vsel %vm558_vm5, %v557_v43, %v555_v62 }
  0xe6   : > { %v420_v47 = vpop.xlane.xlu2 %419  ;;  %v364_v49 = vpop.xlane.xlu1 %363 }
  0xe7   : > { %v657_v50 = vperm.slane %v420_v47, %v1709_v48  ;;  %v404_v52 = vmul.f32 0.015625, %v364_v49  ;;  %v343_v53 = vpop.xlane.xlu0 %342 }
  0xe8   : > { %v397_v56 = vmul.f32 0.015625, %v343_v53 }
  0xe9   : > { %v1789_v57 = vsel %vm550_vm3, %v657_v50, %v656_v59  ;;  %v603_v58 = vperm.slane %v404_v52, %v1709_v48 }
  0xea   : > { %v590_v61 = vperm.slane %v397_v56, %v1752_v44 }
  0xeb   : > { %v1794_v63 = vsel %vm550_vm3, %v603_v58, %v602_v2 }
  0xec   : > { %v591_v0 = vsel %vm554_vm4, %v590_v61, %v589_v18 }
  0xee   : > { %v483_v62 = vpop.xlane.xlu2 %482  ;;  %v465_v1 = vpop.xlane.xlu1 %464 }
  0xef   : > { %v685_v6 = vperm.slane %v465_v1, %v1691_v23  ;;  %v444_v9 = vpop.xlane.xlu0 %443  ;;  %v697_v17 = vperm.slane %v483_v62, %v1682_v19 }
  0xf0   : > { %v672_v10 = vperm.slane %v444_v9, %v1709_v48 }
  0xf1   : > { %v1800_v11 = vsel %vm546_vm2, %v685_v6, %v684_v45  ;;  %v1828_v45 = vadd.s32 4294967240, %v1682_v19 }
  0xf2   : > { %v1803_v15 = vsel %vm550_vm3, %v672_v10, %v671_v32 }
  0xf6   : > { %v325_v2 = vpop.xlane.xlu2 %324  ;;  %v301_v18 = vpop.xlane.xlu1 %300 }
  0xf7   : > { %v391_v20 = vmul.f32 0.015625, %v325_v2  ;;  %v383_v24 = vmul.f32 0.015625, %v301_v18  ;;  %v486_v25 = vpop.xlane.xlu0 %485 }
  0xf8   : > { %v698_v27 = vperm.slane %v486_v25, %v1685_v21 }
  0xf9   : > { %v579_v30 = vperm.slane %v391_v20, %v1806_v16  ;;  %v561_v31 = vperm.slane %v383_v24, %v1806_v16 }
  0xfa   : > { %v1813_v32 = vsel %vm542_vm1, %v698_v27, %v697_v17 }
  0xfb   : > { %v580_v59 = vsel %vm562_vm6, %v579_v30, %v578_v39  ;;  %v563_v35 = vsel %vm562_vm6, %v561_v31, %v559_v46 }
  0xfe   : > { %v1817_v26 = vpop.xlane.xlu2 %422  ;;  %v367_v36 = vpop.xlane.xlu1 %366 }
  0xff   : > { %v346_v29 = vpop.xlane.xlu0 %345 }
 0x100   : > { %v398_v37 = vmul.f32 0.015625, %v346_v29  ;;  %v721_v29 = vld [vmem:[%s2142_s1] sm:$0xf] }
 0x101   : > { %1196 = vmatpush.xpose.msk.msra.mxu0 %vm280_vm0, %v721_v29 }
 0x102   : > { %v592_v38 = vperm.slane %v398_v37, %v1778_v34 }
 0x104   : > { %v593_v21 = vsel %vm558_vm5, %v592_v38, %v591_v0 }
 0x106   : > { %v1821_v40 = vpop.xlane.xlu2 %488  ;;  %v1823_v41 = vpop.xlane.xlu1 %467 }
 0x107   : > { %v1825_v43 = vpop.xlane.xlu0 %446 }
 0x10e   : > { %v349_v39 = vpop.xlane.xlu2 %348  ;;  %v328_v46 = vpop.xlane.xlu1 %327 }
 0x10f   : > { %v392_v47 = vmul.f32 0.015625, %v328_v46  ;;  %v304_v49 = vpop.xlane.xlu0 %303  ;;  %v399_v1 = vmul.f32 0.015625, %v349_v39 }
 0x110   : > { %v384_v50 = vmul.f32 0.015625, %v304_v49 }
 0x111   : > { %v581_v52 = vperm.slane %v392_v47, %v1828_v45  ;;  %v594_v6 = vperm.slane %v399_v1, %v1806_v16  ;;  %v659_v1 = vperm.slane %v1817_v26, %v1752_v44 }
 0x112   : > { %v565_v53 = vperm.slane %v384_v50, %v1828_v45 }
 0x113   : > { %v582_v56 = vsel %vm566_vm7, %v581_v52, %v580_v59  ;;  %v595_v20 = vsel %vm562_vm6, %v594_v6, %v593_v21  ;;  %v405_v59 = vmul.f32 0.015625, %v367_v36  ;;  %v760_v21 = vld [vmem:[%s2144_s3 + $0x38] sm:$0xff]  ;;  %v759_v52 = vld [vmem:[%s2144_s3 + $0x30] sm:$0xff]  ;;  %v660_v26 = vsel %vm554_vm4, %v659_v1, %v1789_v57 }
 0x114   : > { %v567_v58 = vsel %vm566_vm7, %v565_v53, %v563_v35  ;;  %1198 = vmatpush.xpose.msk.msra.mxu1 %vm765_vm10, %v760_v21  ;;  %v687_v57 = vperm.slane %v1823_v41, %v1709_v48 }
 0x115   : > { %v614_v61 = vsel %vm613_vm8, %v582_v56, %v567_v58  ;;  %v605_v38 = vperm.slane %v405_v59, %v1752_v44 }
 0x116   : > { %v450_v0 = vpop.xlane.xlu2 %449  ;;  %v426_v62 = vpop.xlane.xlu1 %425 }
 0x117   : > { %v370_v19 = vpop.xlane.xlu0 %369  ;;  %v606_v53 = vsel %vm554_vm4, %v605_v38, %v1794_v63  ;;  %v676_v6 = vperm.slane %v450_v0, %v1778_v34  ;;  %v758_v63 = vld [vmem:[%s2144_s3 + $0x28] sm:$0xff] }
 0x118   : > { %v406_v35 = vmul.f32 0.015625, %v370_v19  ;;  %1199 = vmatpush.xpose.msk.msra.mxu1 %vm765_vm10, %v759_v52 }
 0x11a   : > { %v607_v39 = vperm.slane %v406_v35, %v1778_v34 }
 0x11c   : > { %v608_v56 = vsel %vm558_vm5, %v607_v39, %v606_v53  ;;  %1200 = vmatpush.xpose.msk.msra.mxu1 %vm765_vm10, %v758_v63 }
 0x11e   : > { %v352_v9 = vpop.xlane.xlu2 %351  ;;  %v1835_v10 = vpop.xlane.xlu1 %491 }
 0x11f   : > { %v400_v17 = vmul.f32 0.015625, %v352_v9  ;;  %v1837_v2 = vpop.xlane.xlu0 %470 }
 0x120   : > { %v689_v38 = vperm.slane %v1837_v2, %v1752_v44  ;;  %v700_v2 = vperm.slane %v1821_v40, %v1691_v23 }
 0x121   : > { %v596_v18 = vperm.slane %v400_v17, %v1828_v45  ;;  %v661_v17 = vperm.slane %v426_v62, %v1778_v34  ;;  %v757_v62 = vld [vmem:[%s2144_s3 + $0x20] sm:$0xff] }
 0x122   : > { %1201 = vmatpush.xpose.msk.msra.mxu1 %vm765_vm10, %v757_v62  ;;  %v701_v63 = vsel %vm546_vm2, %v700_v2, %v1813_v32 }
 0x123   : > { %v597_v24 = vsel %vm566_vm7, %v596_v18, %v595_v20 }
 0x124   : > { %v616_v25 = vsel %vm615_vm9, %v597_v24, %v614_v61  ;;  %v674_v61 = vperm.slane %v1825_v43, %v1752_v44 }
 0x126   : > { %v453_v27 = vpop.xlane.xlu2 %452  ;;  %v429_v30 = vpop.xlane.xlu1 %428  ;;  %v675_v24 = vsel %vm554_vm4, %v674_v61, %v1803_v15  ;;  %v755_v61 = vld [vmem:[%s2144_s3 + $0x10] sm:$0xff] }
 0x127   : > { %v373_v31 = vpop.xlane.xlu0 %372  ;;  %v678_v18 = vperm.slane %v453_v27, %v1806_v16  ;;  %v663_v20 = vperm.slane %v429_v30, %v1806_v16  ;;  %v677_v0 = vsel %vm558_vm5, %v676_v6, %v675_v24 }
 0x128   : > { %v407_v37 = vmul.f32 0.015625, %v373_v31 }
 0x129   : > { %v679_v27 = vsel %vm562_vm6, %v678_v18, %v677_v0 }
 0x12a   : > { %v609_v46 = vperm.slane %v407_v37, %v1806_v16 }
 0x12c   : > { %v610_v19 = vsel %vm562_vm6, %v609_v46, %v608_v56 }
 0x12e   : > { %v376_v36 = vpop.xlane.xlu2 %375  ;;  %v1852_v47 = vpop.xlane.xlu1 %494 }
 0x12f   : > { %v408_v49 = vmul.f32 0.015625, %v376_v36  ;;  %v474_v50 = vpop.xlane.xlu0 %473  ;;  %v756_v36 = vld [vmem:[%s2144_s3 + $0x18] sm:$0xff]  ;;  %v704_v1 = vperm.slane %v1852_v47, %v1752_v44 }
 0x130   : > { %v691_v21 = vperm.slane %v474_v50, %v1778_v34  ;;  %1202 = vmatpush.xpose.msk.msra.mxu1 %vm765_vm10, %v756_v36 }
 0x131   : > { %v611_v58 = vperm.slane %v408_v49, %v1828_v45  ;;  %v688_v49 = vsel %vm550_vm3, %v687_v57, %v1800_v11  ;;  %v702_v11 = vperm.slane %v1835_v10, %v1709_v48  ;;  %v754_v48 = vld [vmem:[%s2144_s3 + $0x8] sm:$0xff] }
 0x132   : > { %v690_v52 = vsel %vm554_vm4, %v689_v38, %v688_v49 }
 0x133   : > { %v612_v9 = vsel %vm566_vm7, %v611_v58, %v610_v19  ;;  %v692_v50 = vsel %vm558_vm5, %v691_v21, %v690_v52  ;;  %v703_v10 = vsel %vm550_vm3, %v702_v11, %v701_v63 }
 0x134   : > { %v618_v43 = vsel %vm617_vm11, %v612_v9, %v616_v25  ;;  %v662_v25 = vsel %vm558_vm5, %v661_v17, %v660_v26  ;;  %1203 = vmatpush.xpose.msk.msra.mxu1 %vm765_vm10, %v755_v61  ;;  %v705_v17 = vsel %vm554_vm4, %v704_v1, %v703_v10  ;;  %v1307_v10 = vld [vmem:[%s1548_s25 + $0x10] sm:$0xff] }
 0x135   : > { %v664_v29 = vsel %vm562_vm6, %v663_v20, %v662_v25  ;;  %v1302_v25 = vld [vmem:[%s2145_s4] ss:$0 sm:$0xff] }
 0x136   : > { %v456_v31 = vpop.xlane.xlu1 %455  ;;  %v477_v15 = vpop.xlane.xlu2 %476 }
 0x137   : > { %v680_v59 = vperm.slane %v456_v31, %v1828_v45  ;;  %v432_v35 = vpop.xlane.xlu0 %431  ;;  %v693_v41 = vperm.slane %v477_v15, %v1806_v16 }
 0x138   : > { %v665_v30 = vperm.slane %v432_v35, %v1828_v45  ;;  %1204 = vmatpush.xpose.msk.msra.mxu1 %vm765_vm10, %v754_v48  ;;  %v1944_v35 = vshrl.u32 %v537_v14, 7 }
 0x139   : > { %v681_v37 = vsel %vm566_vm7, %v680_v59, %v679_v27  ;;  %v694_v19 = vsel %vm562_vm6, %v693_v41, %v692_v50 }
 0x13a   : > { %v666_v39 = vsel %vm566_vm7, %v665_v30, %v664_v29  ;;  %1268 = vset.pattern.permute.xlu1 %v1944_v35  ;;  %v1951_v62 = vadd.s32 8, %v1944_v35  ;;  %v1968_v11 = vadd.s32 48, %v1944_v35  ;;  %v1974_v1 = vadd.s32 56, %v1944_v35 }
 0x13b   : > { %v713_v46 = vsel %vm712_vm12, %v681_v37, %v666_v39 }
 0x13c   : > { %1269 = vset.pattern.permute.xlu2 %v1951_v62 }
 0x13e   : > { %v480_v53 = vpop.xlane.xlu1 %479  ;;  %v501_v6 = vpop.xlane.xlu2 %500 }
 0x13f   : > { %v695_v56 = vperm.slane %v480_v53, %v1828_v45  ;;  %v498_v58 = vpop.xlane.xlu0 %497  ;;  %v708_v44 = vperm.slane %v501_v6, %v1806_v16  ;;  %v753_v16 = vld [vmem:[%s2144_s3] sm:$0xff] }
 0x140   : > { %v706_v40 = vperm.slane %v498_v58, %v1778_v34  ;;  %1205 = vmatpush.xpose.msk.msra.mxu1 %vm765_vm10, %v753_v16  ;;  %v1962_v58 = vadd.s32 32, %v1944_v35 }
 0x141   : > { %v696_v23 = vsel %vm566_vm7, %v695_v56, %v694_v19  ;;  %v1959_v56 = vadd.s32 24, %v1944_v35  ;;  %v869_v19 = vadd.s32 40, %v1944_v35 }
 0x142   : > { %v715_v9 = vsel %vm714_vm13, %v696_v23, %v713_v46  ;;  %v707_v47 = vsel %vm558_vm5, %v706_v40, %v705_v17 }
 0x143   : > { %v709_v32 = vsel %vm562_vm6, %v708_v44, %v707_v47  ;;  %v1308_v47 = vld [vmem:[%s1548_s25] sm:$0xff] }
 0x147   : > { %v504_v34 = vpop.xlane.xlu0 %503 }
 0x148   : > { %v710_v18 = vperm.slane %v504_v34, %v1828_v45  ;;  %v1301_v45 = vld [vmem:[%s2143_s2] ss:$0 sm:$0xff] }
 0x14a   : > { %v711_v20 = vsel %vm566_vm7, %v710_v18, %v709_v32 }
 0x14b   : > { %v717_v24 = vsel %vm716_vm14, %v711_v20, %v715_v9  ;;  %v1309_v20 = vld [vmem:[%s1548_s25 + $0x48] sm:$0xff] }
 0x14c   : > { %v720_v31 = vsel %vm719_vm15, %v618_v43, %v717_v24  ;;  %v1948_v43 = vadd.s32 16, %v1944_v35 }
 0x14d   : > { %1197 = vmatmul.msk.f32.vlgmr.msra.gmra.mxu0 %vm280_vm0, %v720_v31 }
 0x14e   : > { %1270 = vset.pattern.permute.xlu0 %v1948_v43 }
 0x1ca   : > { %v749_v26 = vpop.f32.mrf.mxu0 }
 0x1cb   : > { %v750_v0 = vadd.f32 %v1301_v45, %v749_v26 }
 0x1cd   : > { %v752_v59 = vmax.f32 %v750_v0, 0.0 }
 0x1cf   : > { %1206 = vmatmul.msk.f32.vlgmr.msra.gmra.mxu1 %vm765_vm10, %v752_v59 }
 0x24c   : > { %v810_v27 = vpop.f32.mrf.mxu1 }
 0x24d   : > { %v811_v15 = vadd.f32 %v1302_v25, %v810_v27 }
 0x24f   : > { %v814_v14 = vrot.slane %v811_v15, 4 }
 0x251   : > { %v816_v30 = vadd.f32 %v814_v14, %v811_v15  ;;  %v1311_v15 = vld [vmem:[%s1548_s25 + $0x40] sm:$0xff] }
 0x252   : > { %v1312_v14 = vld [vmem:[%s1548_s25 + $0x60] sm:$0xff] }
 0x253   : > { %v1207_v57 = vmul.f32 -1.442695, %v816_v30 }
 0x255   : > { %1303 = vpow2.f32 %v1207_v57  ;;  %v1313_v57 = vld [vmem:[%s1548_s25 + $0xc0] sm:$0xff] }
 0x25b   : > { %v1304_v29 = vpop.eup %1303 }
 0x25c   : > { %v820_v37 = vadd.f32 1.0, %v1304_v29 }
 0x25e   : > { %1305 = vrcp.f32 %v820_v37  ;;  %v832_v46 = vand.u32 2147483648, %v820_v37  ;;  %v830_v41 = vand.u32 2147483647, %v820_v37  ;;  %vm826_vm2 = vweird.f32 %v820_v37 }
 0x260   : > { %v833_v52 = vor.u32 1.1754944e-38, %v832_v46  ;;  %vm831_vm4 = vcmp.eq.f32.partialorder %v830_v41, 8.507059e+37 }
 0x264   : > { %v1306_v38 = vpop.eup %1305 }
 0x265   : > { %v822_v39 = vmul.f32 %v1306_v38, %v820_v37  ;;  %vm827_vm1 = vweird.f32 %v1306_v38 }
 0x266   : > { %vm828_vm3 = vmor %vm826_vm2, %vm827_vm1 }
 0x267   : > { %v823_v21 = vsub.f32 1.0, %v822_v39 }
 0x269   : > { %v824_v36 = vmul.f32 %v1306_v38, %v823_v21 }
 0x26b   : > { %v825_v49 = vadd.f32 %v1306_v38, %v824_v36 }
 0x26d   : > { %v829_v53 = vsel %vm828_vm3, %v1306_v38, %v825_v49  ;;  %v1314_v38 = vld [vmem:[%s1548_s25 + $0x58] sm:$0xff] }
 0x26e   : > { %v834_v2 = vsel %vm831_vm4, %v833_v52, %v829_v53  ;;  %v1315_v52 = vld [vmem:[%s1548_s25 + $0x68] sm:$0xff] }
 0x26f   : > { %v836_v50 = vperm.slane %v834_v2, 0  ;;  %v885_v61 = vperm.slane %v834_v2, 1  ;;  %v934_v23 = vperm.slane %v834_v2, 2  ;;  %v1982_v40 = vperm.slane %v834_v2, 3  ;;  %v1316_v2 = vld [vmem:[%s1548_s25 + $0x88] sm:$0xff] }
 0x271   : > { %853 = vperm.xlu0 %1270, %v836_v50   ;;  %847 = vperm.xlu2 %1269, %v836_v50  }
 0x272   : > { %841 = vperm.xlu1 %1268, %v836_v50  }
 0x279   : > { %1277 = vset.pattern.permute.xlu0 %v1951_v62  ;;  %1271 = vset.pattern.permute.xlu2 %v1959_v56 }
 0x27a   : > { %1272 = vset.pattern.permute.xlu1 %v1962_v58 }
 0x281   : > { %896 = vperm.xlu0 %1277, %v885_v61   ;;  %859 = vperm.xlu2 %1271, %v836_v50  }
 0x282   : > { %865 = vperm.xlu1 %1272, %v836_v50  }
 0x289   : > { %1282 = vset.pattern.permute.xlu0 %v1968_v11  ;;  %1273 = vset.pattern.permute.xlu2 %v869_v19 }
 0x28a   : > { %1274 = vset.pattern.permute.xlu1 %v1968_v11 }
 0x291   : > { %926 = vperm.xlu0 %1282, %v885_v61   ;;  %871 = vperm.xlu2 %1273, %v836_v50  }
 0x292   : > { %877 = vperm.xlu1 %1274, %v836_v50  }
 0x299   : > { %1287 = vset.pattern.permute.xlu0 %v1959_v56  ;;  %1275 = vset.pattern.permute.xlu2 %v1974_v1 }
 0x29a   : > { %1276 = vset.pattern.permute.xlu1 %v1944_v35 }
 0x2a1   : > { %957 = vperm.xlu0 %1287, %v934_v23   ;;  %883 = vperm.xlu2 %1275, %v836_v50  }
 0x2a2   : > { %890 = vperm.xlu1 %1276, %v885_v61  }
 0x2a9   : > { %1292 = vset.pattern.permute.xlu0 %v1944_v35  ;;  %1278 = vset.pattern.permute.xlu2 %v1948_v43 }
 0x2aa   : > { %1279 = vset.pattern.permute.xlu1 %v1959_v56 }
 0x2b1   : > { %988 = vperm.xlu0 %1292, %v1982_v40   ;;  %902 = vperm.xlu2 %1278, %v885_v61  }
 0x2b2   : > { %908 = vperm.xlu1 %1279, %v885_v61  }
 0x2b9   : > { %1297 = vset.pattern.permute.xlu0 %v869_v19  ;;  %1280 = vset.pattern.permute.xlu2 %v1962_v58 }
 0x2ba   : > { %1281 = vset.pattern.permute.xlu1 %v869_v19 }
 0x2c1   : > { %1018 = vperm.xlu0 %1297, %v1982_v40   ;;  %914 = vperm.xlu2 %1280, %v885_v61  }
 0x2c2   : > { %920 = vperm.xlu1 %1281, %v885_v61  }
 0x2c9   : > { %1283 = vset.pattern.permute.xlu2 %v1974_v1  ;;  %1300 = vset.pattern.permute.xlu0 %v1974_v1 }
 0x2ca   : > { %1284 = vset.pattern.permute.xlu1 %v1944_v35  ;;  %v1310_v35 = vld [vmem:[%s1548_s25 + $0x50] sm:$0xff] }
 0x2cb   : > { %v848_v6 = vpop.permute.xlu2 %847 }
 0x2cc   : > { %v1033_v9 = vmul.f32 %v848_v6, %v1563_v8 }
 0x2ce   : > { %1065 = vst.msk [vmem:[%s1993_s10 + $0x8] sm:$0xff] %vm280_vm0, %v1033_v9 }
 0x2d1   : > { %932 = vperm.xlu2 %1283, %v885_v61  }
 0x2d2   : > { %939 = vperm.xlu1 %1284, %v934_v23  }
 0x2d9   : > { %1285 = vset.pattern.permute.xlu2 %v1951_v62 }
 0x2da   : > { %1286 = vset.pattern.permute.xlu1 %v1948_v43 }
 0x2db   : > { %v860_v63 = vpop.permute.xlu2 %859 }
 0x2dc   : > { %v1035_v48 = vmul.f32 %v860_v63, %v1571_v13 }
 0x2de   : > { %1067 = vst.msk [vmem:[%s1993_s10 + $0x18] sm:$0xff] %vm280_vm0, %v1035_v48 }
 0x2e1   : > { %945 = vperm.xlu2 %1285, %v934_v23  }
 0x2e2   : > { %951 = vperm.xlu1 %1286, %v934_v23  }
 0x2e3   : > { %v854_v8 = vpop.permute.xlu0 %853 }
 0x2e4   : > { %v1034_v17 = vmul.f32 %v1307_v10, %v854_v8  ;;  %v842_v44 = vpop.permute.xlu1 %841  ;;  %v1320_v10 = vld [vmem:[%s1548_s25 + $0xc8] sm:$0xff] }
 0x2e5   : > { %v1032_v34 = vmul.f32 %v1308_v47, %v842_v44 }
 0x2e6   : > { %1066 = vst.msk [vmem:[%s1993_s10 + $0x10] sm:$0xff] %vm280_vm0, %v1034_v17 }
 0x2e7   : > { %1064 = vst.msk [vmem:[%s1993_s10] sm:$0xff] %vm280_vm0, %v1032_v34  ;;  %v1321_v34 = vld [vmem:[%s1548_s25 + $0xd8] sm:$0xff] }
 0x2e9   : > { %1288 = vset.pattern.permute.xlu2 %v1962_v58 }
 0x2ea   : > { %1289 = vset.pattern.permute.xlu1 %v869_v19 }
 0x2eb   : > { %v872_v13 = vpop.permute.xlu2 %871 }
 0x2ec   : > { %v1037_v18 = vmul.f32 %v872_v13, %v1610_v42 }
 0x2ee   : > { %1069 = vst.msk [vmem:[%s1993_s10 + $0x28] sm:$0xff] %vm280_vm0, %v1037_v18  ;;  %v1322_v18 = vld [vmem:[%s1548_s25 + $0xd0] sm:$0xff] }
 0x2f1   : > { %963 = vperm.xlu2 %1288, %v934_v23  }
 0x2f2   : > { %969 = vperm.xlu1 %1289, %v934_v23  }
 0x2f3   : > { %v897_v32 = vpop.permute.xlu0 %896 }
 0x2f4   : > { %v1041_v24 = vmul.f32 %v1309_v20, %v897_v32  ;;  %v866_v31 = vpop.permute.xlu1 %865 }
 0x2f5   : > { %v1036_v16 = vmul.f32 %v866_v31, %v1590_v28  ;;  %v1323_v31 = vld [vmem:[%s1548_s25 + $0xe0] sm:$0xff] }
 0x2f6   : > { %1073 = vst.msk [vmem:[%s1993_s10 + $0x48] sm:$0xff] %vm280_vm0, %v1041_v24 }
 0x2f7   : > { %1068 = vst.msk [vmem:[%s1993_s10 + $0x20] sm:$0xff] %vm280_vm0, %v1036_v16 }
 0x2f9   : > { %1290 = vset.pattern.permute.xlu2 %v1968_v11 }
 0x2fa   : > { %1291 = vset.pattern.permute.xlu1 %v1974_v1 }
 0x2fb   : > { %v884_v42 = vpop.permute.xlu2 %883 }
 0x2fc   : > { %v1039_v45 = vmul.f32 %v884_v42, %v1665_v5 }
 0x2fe   : > { %1071 = vst.msk [vmem:[%s1993_s10 + $0x38] sm:$0xff] %vm280_vm0, %v1039_v45 }
 0x301   : > { %975 = vperm.xlu2 %1290, %v934_v23  }
 0x302   : > { %981 = vperm.xlu1 %1291, %v934_v23   ;;  %v1319_v23 = vld [vmem:[%s1548_s25 + $0x90] sm:$0xff] }
 0x303   : > { %v927_v26 = vpop.permute.xlu0 %926 }
 0x304   : > { %v1046_v28 = vmul.f32 %v927_v26, %v1632_v54  ;;  %v878_v0 = vpop.permute.xlu1 %877 }
 0x305   : > { %v1038_v59 = vmul.f32 %v878_v0, %v1635_v55 }
 0x306   : > { %1078 = vst.msk [vmem:[%s1993_s10 + $0x70] sm:$0xff] %vm280_vm0, %v1046_v28 }
 0x307   : > { %1070 = vst.msk [vmem:[%s1993_s10 + $0x30] sm:$0xff] %vm280_vm0, %v1038_v59 }
 0x309   : > { %1293 = vset.pattern.permute.xlu2 %v1951_v62 }
 0x30a   : > { %1294 = vset.pattern.permute.xlu1 %v1948_v43 }
 0x30b   : > { %v903_v5 = vpop.permute.xlu2 %902 }
 0x30c   : > { %v1042_v25 = vmul.f32 %v1310_v35, %v903_v5 }
 0x30e   : > { %1074 = vst.msk [vmem:[%s1993_s10 + $0x50] sm:$0xff] %vm280_vm0, %v1042_v25 }
 0x311   : > { %994 = vperm.xlu2 %1293, %v1982_v40  }
 0x312   : > { %1000 = vperm.xlu1 %1294, %v1982_v40  }
 0x313   : > { %v958_v54 = vpop.permute.xlu0 %957 }
 0x314   : > { %v1051_v55 = vmul.f32 %v958_v54, %v1598_v33  ;;  %v891_v27 = vpop.permute.xlu1 %890 }
 0x315   : > { %v1040_v62 = vmul.f32 %v1311_v15, %v891_v27 }
 0x316   : > { %1083 = vst.msk [vmem:[%s1993_s10 + $0x98] sm:$0xff] %vm280_vm0, %v1051_v55 }
 0x317   : > { %1072 = vst.msk [vmem:[%s1993_s10 + $0x40] sm:$0xff] %vm280_vm0, %v1040_v62 }
 0x319   : > { %1295 = vset.pattern.permute.xlu2 %v1959_v56 }
 0x31a   : > { %1296 = vset.pattern.permute.xlu1 %v1962_v58  ;;  %v1317_v58 = vld [vmem:[%s1548_s25 + $0x80] sm:$0xff] }
 0x31b   : > { %v915_v43 = vpop.permute.xlu2 %914 }
 0x31c   : > { %v1044_v30 = vmul.f32 %v1312_v14, %v915_v43 }
 0x31e   : > { %1076 = vst.msk [vmem:[%s1993_s10 + $0x60] sm:$0xff] %vm280_vm0, %v1044_v30 }
 0x321   : > { %1006 = vperm.xlu2 %1295, %v1982_v40  }
 0x322   : > { %1012 = vperm.xlu1 %1296, %v1982_v40  }
 0x323   : > { %v989_v33 = vpop.permute.xlu0 %988 }
 0x324   : > { %v1056_v29 = vmul.f32 %v1313_v57, %v989_v33  ;;  %v909_v37 = vpop.permute.xlu1 %908 }
 0x325   : > { %v1043_v39 = vmul.f32 %v1314_v38, %v909_v37 }
 0x326   : > { %1088 = vst.msk [vmem:[%s1993_s10 + $0xc0] sm:$0xff] %vm280_vm0, %v1056_v29 }
 0x327   : > { %1075 = vst.msk [vmem:[%s1993_s10 + $0x58] sm:$0xff] %vm280_vm0, %v1043_v39 }
 0x329   : > { %1298 = vset.pattern.permute.xlu2 %v1968_v11  ;;  %v1318_v11 = vld [vmem:[%s1548_s25 + $0xa0] sm:$0xff]  ;;  %s1368_s25 = sshra.s32 %s1113_s13, 4  ;;  %s1369_s25 = int_to_ptr.hbm [resolvable:$true] %s1368_s25 }
 0x32a   : > { %1299 = vset.pattern.permute.xlu1 %v1974_v1  ;;  %s1370_s16 = scalar_lea.hbm %s1369_s25, 256  ;;  %p1375_p0 = scmp.lt.s32.totalorder %s1369_s25, %s2146_s5 }
 0x32b   : > { %v933_v21 = vpop.permute.xlu2 %932  ;;  %p1371_p6 = scmp.ne.s32.totalorder %s1369_s25, %s1370_s16  ;;  %p1376_p1 = scmp.lt.s32.totalorder %s1374_s26, %s1370_s16 }
 0x32c   : > { %v1047_v46 = vmul.f32 %v933_v21, %v1662_v4 }
 0x32d   : > { %p1372_p9 = pnand %p1371_p6, %p1506_p11  ;;  %p1377_p3 = por %p1376_p1, %p1375_p0 }
 0x32e   : > { %1079 = vst.msk [vmem:[%s1993_s10 + $0x78] sm:$0xff] %vm280_vm0, %v1047_v46 }
 0x32f   : > { %p1373_p13 = pneg %p1372_p9 }
 0x331   : > { %1024 = vperm.xlu2 %1298, %v1982_v40   ;;  %p1378_p4 = pnand %p1377_p3, %p1373_p13 }
 0x332   : > { %1030 = vperm.xlu1 %1299, %v1982_v40  }
 0x333   : > { %v1019_v36 = vpop.permute.xlu0 %1018 }
 0x334   : > { %v1061_v41 = vmul.f32 %v1019_v36, %v1674_v12  ;;  %v921_v49 = vpop.permute.xlu1 %920 }
 0x335   : > { %v1045_v53 = vmul.f32 %v1315_v52, %v921_v49 }
 0x336   : > { %1093 = vst.msk [vmem:[%s1993_s10 + $0xe8] sm:$0xff] %vm280_vm0, %v1061_v41 }
 0x337   : > { %1077 = vst.msk [vmem:[%s1993_s10 + $0x68] sm:$0xff] %vm280_vm0, %v1045_v53 }
 0x33b   : > { %v946_v4 = vpop.permute.xlu2 %945 }
 0x33c   : > { %v1049_v50 = vmul.f32 %v1316_v2, %v946_v4 }
 0x33e   : > { %1081 = vst.msk [vmem:[%s1993_s10 + $0x88] sm:$0xff] %vm280_vm0, %v1049_v50 }
 0x344   : > { %v940_v56 = vpop.permute.xlu1 %939 }
 0x345   : > { %v1048_v12 = vmul.f32 %v1317_v58, %v940_v56 }
 0x347   : > { %1080 = vst.msk [vmem:[%s1993_s10 + $0x80] sm:$0xff] %vm280_vm0, %v1048_v12 }
 0x34b   : > { %v964_v61 = vpop.permute.xlu2 %963 }
 0x34c   : > { %v1052_v19 = vmul.f32 %v1318_v11, %v964_v61 }
 0x34e   : > { %1084 = vst.msk [vmem:[%s1993_s10 + $0xa0] sm:$0xff] %vm280_vm0, %v1052_v19 }
 0x354   : > { %v952_v1 = vpop.permute.xlu1 %951 }
 0x355   : > { %v1050_v40 = vmul.f32 %v1319_v23, %v952_v1 }
 0x357   : > { %1082 = vst.msk [vmem:[%s1993_s10 + $0x90] sm:$0xff] %vm280_vm0, %v1050_v40 }
 0x35b   : > { %v976_v6 = vpop.permute.xlu2 %975 }
 0x35c   : > { %v1054_v9 = vmul.f32 %v976_v6, %v1659_v3 }
 0x35e   : > { %1086 = vst.msk [vmem:[%s1993_s10 + $0xb0] sm:$0xff] %vm280_vm0, %v1054_v9 }
 0x364   : > { %v970_v63 = vpop.permute.xlu1 %969 }
 0x365   : > { %v1053_v48 = vmul.f32 %v970_v63, %v1646_v60 }
 0x367   : > { %1085 = vst.msk [vmem:[%s1993_s10 + $0xa8] sm:$0xff] %vm280_vm0, %v1053_v48 }
 0x36b   : > { %v995_v8 = vpop.permute.xlu2 %994 }
 0x36c   : > { %v1057_v17 = vmul.f32 %v1320_v10, %v995_v8 }
 0x36e   : > { %1089 = vst.msk [vmem:[%s1993_s10 + $0xc8] sm:$0xff] %vm280_vm0, %v1057_v17 }
 0x374   : > { %v982_v44 = vpop.permute.xlu1 %981 }
 0x375   : > { %v1055_v47 = vmul.f32 %v982_v44, %v1688_v22 }
 0x377   : > { %1087 = vst.msk [vmem:[%s1993_s10 + $0xb8] sm:$0xff] %vm280_vm0, %v1055_v47 }
 0x37b   : > { %v1007_v3 = vpop.permute.xlu2 %1006 }
 0x37c   : > { %v1059_v60 = vmul.f32 %v1321_v34, %v1007_v3 }
 0x37e   : > { %1091 = vst.msk [vmem:[%s1993_s10 + $0xd8] sm:$0xff] %vm280_vm0, %v1059_v60 }
 0x384   : > { %v1001_v13 = vpop.permute.xlu1 %1000 }
 0x385   : > { %v1058_v32 = vmul.f32 %v1322_v18, %v1001_v13 }
 0x387   : > { %1090 = vst.msk [vmem:[%s1993_s10 + $0xd0] sm:$0xff] %vm280_vm0, %v1058_v32 }
 0x38b   : > { %v1025_v20 = vpop.permute.xlu2 %1024 }
 0x38c   : > { %v1062_v22 = vmul.f32 %v1025_v20, %v1713_v51 }
 0x38e   : > { %1094 = vst.msk [vmem:[%s1993_s10 + $0xf0] sm:$0xff] %vm280_vm0, %v1062_v22 }
 0x394   : > { %v1013_v24 = vpop.permute.xlu1 %1012 }
 0x395   : > { %v1060_v16 = vmul.f32 %v1323_v31, %v1013_v24 }
 0x397   : > { %1092 = vst.msk [vmem:[%s1993_s10 + $0xe0] sm:$0xff] %vm280_vm0, %v1060_v16 }
 0x3a4   : > { %v1031_v42 = vpop.permute.xlu1 %1030 }
 0x3a5   : > { %v1063_v51 = vmul.f32 %v1031_v42, %v1727_v7 }
 0x3a7   : > { %1095 = vst.msk [vmem:[%s1993_s10 + $0xf8] sm:$0xff] %vm280_vm0, %v1063_v51 }
 0x3a8   : > { %1381 = shalt.err (!%p1378_p4)
}
 0x3a9   : > { %s1424_s12 = smov 128   ;;  %s1425_s9 = smov 8  }
 0x3aa   : > { %1220 = dma.vmem_to_hbm [thread:$0]  (%p1506_p11), %s1111_s29, 4096, %s1113_s13, %s1097_s15, %s1424_s12, %s1424_s12, %s1425_s9  }
 0x3ab PF: > { %s1127_s10 = sand.u32 1, %s1408_s18   ;;  %p2152_p7 = scmp.ge.s32.totalorder %s1420_s21, 2 }
 0x3ac   : > { %s1128_s14 = scalar_lea.sflag [#allocation4], %s1127_s10 }
 0x3ad   : > { %p1227_p5 = pnand %p2152_p7, %p1510_p12 }
 0x3af   : > { %p1228_p8 = pneg %p1227_p5 }
 0x3b1   : > { %1403 = dma.done.wait (%p1228_p8), %s1128_s14, 4096  }
 0x3b2   : > { %1405 = vsyncadd (%p1228_p8), %s1128_s14, 4294963200  ;;  %p18_p10 = scmp.ge.s32.totalorder %s1481_s24, 4   ;;  %s2153_s18 = smov %s1412_s19 }
 0x3b3   : > { %s2154_s19 = smov %s1416_s20  ;;  %s2155_s20 = smov %s1493_s27 }
 0x3b4   : > { %s2156_s21 = smov %s1481_s24  ;;  %20 = sbr.rel (!%p18_p10) target bundleno = 5 (0x5), region = 85 }
 0x3b9   :  { %1134 = vsyncpa [#allocation3], 1 }
 0x3ba   :  { %1136 = vsyncpa [#allocation3 + $0x1], 1 }
 0x3bb   :  { %1137 = vsyncpa [#allocation4], 1 }
 0x3bc   :  { %1139 = vsyncpa [#allocation4 + $0x1], 1 }

</bundles_post_ra>
